<compile_context>
chip_gen: v5e
topology: v5e:2x2
jax: 0.10.0
libtpu: 0.0.40
codegen_flags: <defaults>
</compile_context>

<pallas_src>
import jax
import jax.numpy as jnp
from jax import lax
from jax.experimental import pallas as pl
from jax.experimental.pallas import tpu as pltpu

# ------------------------- small config -------------------------
N_VOCAB = 50
EMBED = 32
HIDDEN = 32
NUM_LAYERS = 1
PAD_SIZE = 8            # sequence length == MaxPool1d kernel size
NUM_CLASSES = 4
BATCH = 4               # R = 2*BATCH = 8 -> full sublane occupancy per step


def _rcnn_kernel(sel_ref, emb2_ref, wih_ref, whh_ref, fc_ref, out_ref):
    """Full post-token-id forward for one small batch, single grid point.

    sel_ref  : (L*2B, 1) int32  selection ids; row t*2B+j is x[j,t] (fwd, j<B)
                                or N_VOCAB + x[j-B, L-1-t] (bwd, j>=B)
    emb2_ref : (2NV, 2E+2)      block-diag doubled-vocab embedding table with
                                direction-indicator lanes 2E (fwd) / 2E+1 (bwd)
    wih_ref  : (2E+2, 4H)       [wih_f^T ; wih_b^T ; b_f ; b_b], gate order
                                i,f,g,o; i/f/o columns pre-scaled by 0.5
    whh_ref  : (2H, 4H)         [whh_f^T ; whh_b^T], same column pre-scale
    fc_ref   : (E+2H+1, C)      classifier weight with bias as last row
    out_ref  : (B, C)           softmax probabilities
    """
    f32 = jnp.float32
    B, C = out_ref.shape
    H = whh_ref.shape[0] // 2
    E = (wih_ref.shape[0] - 2) // 2
    R = 2 * B                              # stacked rows per step (fwd + bwd)
    L = sel_ref.shape[0] // R
    NV2 = emb2_ref.shape[0]

    # 1) Embedding gather as a one-hot MXU matmul, landing directly in the
    #    stacked block-diagonal layout:
    #    fwd rows = [emb_t | 0 | 1 | 0], bwd rows = [0 | emb_{L-1-t} | 0 | 1].
    sel = sel_ref[...]                                               # (L*R, 1)
    vocab = lax.broadcasted_iota(jnp.int32, (L * R, NV2), 1)
    onehot = jnp.where(sel == vocab, 1.0, 0.0).astype(f32)           # (L*R, 2NV)
    emb_st = jnp.dot(onehot, emb2_ref[...],
                     preferred_element_type=f32)                     # (L*R, 2E+2)

    # 2) Hoisted input->gate matmul, all timesteps and both directions at once;
    #    the per-direction LSTM bias is folded in via the indicator lanes.
    gx = jnp.dot(emb_st, wih_ref[...], preferred_element_type=f32)   # (L*R, 4H)

    # 3) ReLU + MaxPool1d(L) of the embedding slice of the concat feature.
    #    Tile-aligned (R, .) row-slice maxima; ReLU applied once at the end.
    m = emb_st[0:R, :]
    for t in range(1, L):
        m = jnp.maximum(m, emb_st[t * R:(t + 1) * R, :])
    max_emb = jnp.maximum(m[0:B, 0:E], 0.0)                          # (B, E)

    # Direction mask for the block-diagonal recurrent lhs layout:
    # fwd rows keep lanes 0:H, bwd rows keep lanes H:2H.
    rr = lax.broadcasted_iota(jnp.int32, (R, 2 * H), 0)
    cc = lax.broadcasted_iota(jnp.int32, (R, 2 * H), 1)
    keep = ((rr < B) & (cc < H)) | ((rr >= B) & (cc >= H))
    dir_mask = jnp.where(keep, 1.0, 0.0).astype(f32)                 # (R, 2H)

    whh = whh_ref[...]                                               # (2H, 4H)
    h_lhs = jnp.zeros((R, 2 * H), f32)
    c = jnp.zeros((R, H), f32)
    mh = jnp.zeros((R, H), f32)       # running max_t relu(h_t), both directions

    # 4) Fused fwd+bwd LSTM recurrence, fully unrolled (L static): per step one
    #    (R,2H)@(2H,4H) MXU matmul + ONE tanh over the full (8,128) gate tile
    #    (sigmoid recovered as 0.5*tanh + 0.5 thanks to the weight pre-scale)
    #    + one tanh on the (8,H) cell state.
    for i in range(L):
        gates = gx[i * R:(i + 1) * R, :] + jnp.dot(
            h_lhs, whh, preferred_element_type=f32)                  # (R, 4H)
        tg = jnp.tanh(gates)
        sg = 0.5 * tg + 0.5
        c = sg[:, H:2 * H] * c + sg[:, 0:H] * tg[:, 2 * H:3 * H]
        h = sg[:, 3 * H:4 * H] * jnp.tanh(c)                          # (R, H)
        mh = jnp.maximum(mh, h)
        h_lhs = jnp.concatenate([h, h], axis=-1) * dir_mask           # (R, 2H)

    # 5) cat((embed, h_fwd, h_bwd)) feature (+ ones column for the fc bias row),
    #    fc, softmax(dim=1).
    feat = jnp.concatenate(
        [max_emb, mh[0:B, :], mh[B:R, :], jnp.ones((B, 1), f32)], axis=-1)
    logits = jnp.dot(feat, fc_ref[...], preferred_element_type=f32)   # (B, C)
    logits = logits - jnp.max(logits, axis=1, keepdims=True)
    e = jnp.exp(logits)
    inv = pl.reciprocal(jnp.sum(e, axis=1, keepdims=True), approx=False)
    out_ref[...] = e * inv


def init_params(key):
    ks = jax.random.split(key, 10)
    s = 1.0 / float(HIDDEN) ** 0.5
    H, E = HIDDEN, EMBED

    def u(k, shape, scale):
        return jax.random.uniform(k, shape, jnp.float32, -scale, scale)

    emb = jax.random.normal(ks[0], (N_VOCAB, E), jnp.float32)
    emb = emb.at[N_VOCAB - 1].set(0.0)          # padding_idx = n_vocab - 1

    wih_f = u(ks[1], (4 * H, E), s)
    whh_f = u(ks[2], (4 * H, H), s)
    bih_f = u(ks[3], (4 * H,), s)
    bhh_f = u(ks[4], (4 * H,), s)
    wih_b = u(ks[5], (4 * H, E), s)
    whh_b = u(ks[6], (4 * H, H), s)
    bih_b = u(ks[7], (4 * H,), s)
    bhh_b = u(ks[8], (4 * H,), s)

    fan_in = 2 * H + E
    sf = 1.0 / float(fan_in) ** 0.5
    fc_w = u(ks[9], (NUM_CLASSES, fan_in), sf)
    fc_b = jnp.zeros((NUM_CLASSES,), jnp.float32)

    # sigmoid-via-tanh pre-scale: halve i/f/o gate columns so the kernel only
    # needs tanh per step (sigmoid(a) = 0.5 + 0.5*tanh(a/2)); g stays tanh(a).
    gate_scale = jnp.concatenate(
        [jnp.full((H,), 0.5), jnp.full((H,), 0.5),
         jnp.ones((H,)), jnp.full((H,), 0.5)]).astype(jnp.float32)    # (4H,)

    # Input->gate weights, both directions stacked, per-direction bias folded in
    # as two extra rows selected by the direction-indicator lanes of emb2.
    wih_st = jnp.concatenate(
        [wih_f.T, wih_b.T,
         (bih_f + bhh_f)[None, :], (bih_b + bhh_b)[None, :]],
        axis=0) * gate_scale[None, :]                                 # (2E+2, 4H)
    whh_st = jnp.concatenate([whh_f.T, whh_b.T],
                             axis=0) * gate_scale[None, :]            # (2H, 4H)

    # Doubled-vocab block-diagonal embedding table with direction-indicator
    # lanes (lane 2E selects b_fwd, lane 2E+1 selects b_bwd).
    z = jnp.zeros_like(emb)
    one = jnp.ones((N_VOCAB, 1), jnp.float32)
    zero = jnp.zeros((N_VOCAB, 1), jnp.float32)
    emb2 = jnp.concatenate(
        [jnp.concatenate([emb, z, one, zero], axis=1),
         jnp.concatenate([z, emb, zero, one], axis=1)], axis=0)       # (2NV, 2E+2)

    fc_wb = jnp.concatenate([fc_w.T, fc_b[None, :]], axis=0)          # (E+2H+1, C)

    kernel_params = dict(emb2=emb2, wih_st=wih_st, whh_st=whh_st, fc_wb=fc_wb)
    raw_params = dict(embedding=emb, wih_f=wih_f, whh_f=whh_f, bih_f=bih_f,
                      bhh_f=bhh_f, wih_b=wih_b, whh_b=whh_b, bih_b=bih_b,
                      bhh_b=bhh_b, fc_w=fc_w, fc_b=fc_b)
    return kernel_params, raw_params


@jax.jit
def model_forward(x, params):
    B, L = x.shape
    C = params['fc_wb'].shape[-1]
    NV = params['emb2'].shape[0] // 2

    # The only pre-kernel XLA work: a tiny int32 index shuffle (256 B) building
    # the selection ids for the in-kernel one-hot embedding gather.
    ids_f = x.T.astype(jnp.int32)                      # (L, B)  fwd: x[b, t]
    ids_b = x[:, ::-1].T.astype(jnp.int32) + NV        # (L, B)  bwd: x[b, L-1-t]
    sel = jnp.stack([ids_f, ids_b], axis=1).reshape(L * 2 * B, 1)

    vmem = pl.BlockSpec(memory_space=pltpu.MemorySpace.VMEM)
    return pl.pallas_call(
        _rcnn_kernel,
        out_shape=jax.ShapeDtypeStruct((B, C), jnp.float32),
        in_specs=[vmem] * 5,
        out_specs=vmem,
    )(sel, params['emb2'], params['wih_st'], params['whh_st'], params['fc_wb'])


@jax.jit
def reference_forward(x, raw):
    """Pure-JAX reference of the intended forward (for validation)."""
    hp = jax.lax.Precision.HIGHEST
    dot = lambda a, b: jnp.dot(a, b, precision=hp)
    embed = raw['embedding'][x]                        # (B, L, E)
    B, L, _ = embed.shape
    H = HIDDEN

    def run_dir(seq, wih, whh, bih, bhh):
        h = jnp.zeros((B, H), jnp.float32)
        c = jnp.zeros((B, H), jnp.float32)
        hs = []
        for t in range(L):
            g = dot(seq[:, t], wih.T) + bih + dot(h, whh.T) + bhh
            i = jax.nn.sigmoid(g[:, 0:H])
            f = jax.nn.sigmoid(g[:, H:2 * H])
            gg = jnp.tanh(g[:, 2 * H:3 * H])
            o = jax.nn.sigmoid(g[:, 3 * H:4 * H])
            c = f * c + i * gg
            h = o * jnp.tanh(c)
            hs.append(h)
        return jnp.stack(hs, axis=1)                   # (B, L, H)

    hf = run_dir(embed, raw['wih_f'], raw['whh_f'], raw['bih_f'], raw['bhh_f'])
    hb = run_dir(embed[:, ::-1], raw['wih_b'], raw['whh_b'],
                 raw['bih_b'], raw['bhh_b'])[:, ::-1]
    out = jax.nn.relu(jnp.concatenate([embed, hf, hb], axis=2))
    pooled = jnp.max(out, axis=1)                      # (B, E+2H)
    logits = dot(pooled, raw['fc_w'].T) + raw['fc_b']
    return jax.nn.softmax(logits, axis=1)


if __name__ == "__main__":
    key = jax.random.PRNGKey(0)
    k_param, k_x = jax.random.split(key)
    params, raw = init_params(k_param)
    x = jax.random.randint(k_x, (BATCH, PAD_SIZE), 0, N_VOCAB, dtype=jnp.int32)

    out = jax.block_until_ready(model_forward(x, params))

    assert out.shape == (BATCH, NUM_CLASSES), out.shape
    assert bool(jnp.all(jnp.isfinite(out)))
    row_sums = jnp.sum(out, axis=1)
    assert bool(jnp.allclose(row_sums, 1.0, atol=1e-4)), row_sums

    # Semantic check vs pure-JAX reference (tolerance covers sigmoid-via-tanh
    # hardware approximation and MXU-vs-XLA matmul precision differences).
    ref = jax.block_until_ready(reference_forward(x, raw))
    assert bool(jnp.allclose(out, ref, atol=2e-2)), float(jnp.max(jnp.abs(out - ref)))

    print("KERNEL_OK")
</pallas_src>

<mosaic_0001>
module attributes {stable_mosaic.version = 11 : i64} {
  func.func @_rcnn_kernel(%arg0: memref<64x1xi32, #tpu.memory_space<vmem>>, %arg1: memref<100x66xf32, #tpu.memory_space<vmem>>, %arg2: memref<66x128xf32, #tpu.memory_space<vmem>>, %arg3: memref<64x128xf32, #tpu.memory_space<vmem>>, %arg4: memref<97x4xf32, #tpu.memory_space<vmem>>, %arg5: memref<4x4xf32, #tpu.memory_space<vmem>>) attributes {dimension_semantics = [], scalar_prefetch = 0 : i64, scratch_operands = 0 : i64, tpu.core_type = #tpu.core_type<tc>} {
    %c0 = arith.constant 0 : index
    %c0_0 = arith.constant 0 : index
    %0 = vector.load %arg0[%c0, %c0_0] : memref<64x1xi32, #tpu.memory_space<vmem>>, vector<64x1xi32>
    %1 = tpu.iota {dimensions = array<i32: 1>} : vector<64x100xi32>
    %2 = vector.broadcast %0 : vector<64x1xi32> to vector<64x100xi32>
    %3 = arith.cmpi eq, %2, %1 : vector<64x100xi32>
    %cst = arith.constant 1.000000e+00 : f32
    %cst_1 = arith.constant 0.000000e+00 : f32
    %4 = vector.broadcast %cst : f32 to vector<64x100xf32>
    %5 = vector.broadcast %cst_1 : f32 to vector<64x100xf32>
    %6 = arith.select %3, %4, %5 : vector<64x100xi1>, vector<64x100xf32>
    %c0_2 = arith.constant 0 : index
    %c0_3 = arith.constant 0 : index
    %7 = vector.load %arg1[%c0_2, %c0_3] : memref<100x66xf32, #tpu.memory_space<vmem>>, vector<100x66xf32>
    %cst_4 = arith.constant dense<0.000000e+00> : vector<64x66xf32>
    %8 = tpu.matmul %6, %7, %cst_4 {dimension_numbers = #tpu.dot_dimension_numbers<[1], [0], [0], [1], [0, 0, 1, 1], [], []>} : vector<64x100xf32>, vector<100x66xf32>, vector<64x66xf32> -> vector<64x66xf32>
    %c0_5 = arith.constant 0 : index
    %c0_6 = arith.constant 0 : index
    %9 = vector.load %arg2[%c0_5, %c0_6] : memref<66x128xf32, #tpu.memory_space<vmem>>, vector<66x128xf32>
    %cst_7 = arith.constant dense<0.000000e+00> : vector<64x128xf32>
    %10 = tpu.matmul %8, %9, %cst_7 {dimension_numbers = #tpu.dot_dimension_numbers<[1], [0], [0], [1], [0, 0, 1, 1], [], []>} : vector<64x66xf32>, vector<66x128xf32>, vector<64x128xf32> -> vector<64x128xf32>
    %11 = vector.extract_strided_slice %8 {offsets = [0, 0], sizes = [8, 66], strides = [1, 1]} : vector<64x66xf32> to vector<8x66xf32>
    %12 = vector.extract_strided_slice %8 {offsets = [8, 0], sizes = [8, 66], strides = [1, 1]} : vector<64x66xf32> to vector<8x66xf32>
    %13 = arith.maximumf %11, %12 : vector<8x66xf32>
    %14 = vector.extract_strided_slice %8 {offsets = [16, 0], sizes = [8, 66], strides = [1, 1]} : vector<64x66xf32> to vector<8x66xf32>
    %15 = arith.maximumf %13, %14 : vector<8x66xf32>
    %16 = vector.extract_strided_slice %8 {offsets = [24, 0], sizes = [8, 66], strides = [1, 1]} : vector<64x66xf32> to vector<8x66xf32>
    %17 = arith.maximumf %15, %16 : vector<8x66xf32>
    %18 = vector.extract_strided_slice %8 {offsets = [32, 0], sizes = [8, 66], strides = [1, 1]} : vector<64x66xf32> to vector<8x66xf32>
    %19 = arith.maximumf %17, %18 : vector<8x66xf32>
    %20 = vector.extract_strided_slice %8 {offsets = [40, 0], sizes = [8, 66], strides = [1, 1]} : vector<64x66xf32> to vector<8x66xf32>
    %21 = arith.maximumf %19, %20 : vector<8x66xf32>
    %22 = vector.extract_strided_slice %8 {offsets = [48, 0], sizes = [8, 66], strides = [1, 1]} : vector<64x66xf32> to vector<8x66xf32>
    %23 = arith.maximumf %21, %22 : vector<8x66xf32>
    %24 = vector.extract_strided_slice %8 {offsets = [56, 0], sizes = [8, 66], strides = [1, 1]} : vector<64x66xf32> to vector<8x66xf32>
    %25 = arith.maximumf %23, %24 : vector<8x66xf32>
    %26 = vector.extract_strided_slice %25 {offsets = [0, 0], sizes = [4, 32], strides = [1, 1]} : vector<8x66xf32> to vector<4x32xf32>
    %cst_8 = arith.constant 0.000000e+00 : f32
    %27 = vector.broadcast %cst_8 : f32 to vector<4x32xf32>
    %28 = arith.maximumf %26, %27 : vector<4x32xf32>
    %29 = tpu.iota {dimensions = array<i32: 0>} : vector<8x64xi32>
    %30 = tpu.iota {dimensions = array<i32: 1>} : vector<8x64xi32>
    %c4_i32 = arith.constant 4 : i32
    %31 = vector.broadcast %c4_i32 : i32 to vector<8x64xi32>
    %32 = arith.cmpi slt, %29, %31 : vector<8x64xi32>
    %c32_i32 = arith.constant 32 : i32
    %33 = vector.broadcast %c32_i32 : i32 to vector<8x64xi32>
    %34 = arith.cmpi slt, %30, %33 : vector<8x64xi32>
    %35 = arith.andi %32, %34 : vector<8x64xi1>
    %c4_i32_9 = arith.constant 4 : i32
    %36 = vector.broadcast %c4_i32_9 : i32 to vector<8x64xi32>
    %37 = arith.cmpi sge, %29, %36 : vector<8x64xi32>
    %c32_i32_10 = arith.constant 32 : i32
    %38 = vector.broadcast %c32_i32_10 : i32 to vector<8x64xi32>
    %39 = arith.cmpi sge, %30, %38 : vector<8x64xi32>
    %40 = arith.andi %37, %39 : vector<8x64xi1>
    %41 = arith.ori %35, %40 : vector<8x64xi1>
    %cst_11 = arith.constant 1.000000e+00 : f32
    %cst_12 = arith.constant 0.000000e+00 : f32
    %42 = vector.broadcast %cst_11 : f32 to vector<8x64xf32>
    %43 = vector.broadcast %cst_12 : f32 to vector<8x64xf32>
    %44 = arith.select %41, %42, %43 : vector<8x64xi1>, vector<8x64xf32>
    %c0_13 = arith.constant 0 : index
    %c0_14 = arith.constant 0 : index
    %45 = vector.load %arg3[%c0_13, %c0_14] : memref<64x128xf32, #tpu.memory_space<vmem>>, vector<64x128xf32>
    %cst_15 = arith.constant 0.000000e+00 : f32
    %46 = vector.broadcast %cst_15 : f32 to vector<8x64xf32>
    %cst_16 = arith.constant 0.000000e+00 : f32
    %47 = vector.broadcast %cst_16 : f32 to vector<8x32xf32>
    %cst_17 = arith.constant 0.000000e+00 : f32
    %48 = vector.broadcast %cst_17 : f32 to vector<8x32xf32>
    %49 = vector.extract_strided_slice %10 {offsets = [0, 0], sizes = [8, 128], strides = [1, 1]} : vector<64x128xf32> to vector<8x128xf32>
    %cst_18 = arith.constant dense<0.000000e+00> : vector<8x128xf32>
    %50 = tpu.matmul %46, %45, %cst_18 {dimension_numbers = #tpu.dot_dimension_numbers<[1], [0], [0], [1], [0, 0, 1, 1], [], []>} : vector<8x64xf32>, vector<64x128xf32>, vector<8x128xf32> -> vector<8x128xf32>
    %51 = arith.addf %49, %50 : vector<8x128xf32>
    %52 = math.tanh %51 : vector<8x128xf32>
    %cst_19 = arith.constant 5.000000e-01 : f32
    %53 = vector.broadcast %cst_19 : f32 to vector<8x128xf32>
    %54 = arith.mulf %53, %52 : vector<8x128xf32>
    %cst_20 = arith.constant 5.000000e-01 : f32
    %55 = vector.broadcast %cst_20 : f32 to vector<8x128xf32>
    %56 = arith.addf %54, %55 : vector<8x128xf32>
    %57 = vector.extract_strided_slice %56 {offsets = [0, 32], sizes = [8, 32], strides = [1, 1]} : vector<8x128xf32> to vector<8x32xf32>
    %58 = arith.mulf %57, %47 : vector<8x32xf32>
    %59 = vector.extract_strided_slice %56 {offsets = [0, 0], sizes = [8, 32], strides = [1, 1]} : vector<8x128xf32> to vector<8x32xf32>
    %60 = vector.extract_strided_slice %52 {offsets = [0, 64], sizes = [8, 32], strides = [1, 1]} : vector<8x128xf32> to vector<8x32xf32>
    %61 = arith.mulf %59, %60 : vector<8x32xf32>
    %62 = arith.addf %58, %61 : vector<8x32xf32>
    %63 = vector.extract_strided_slice %56 {offsets = [0, 96], sizes = [8, 32], strides = [1, 1]} : vector<8x128xf32> to vector<8x32xf32>
    %64 = math.tanh %62 : vector<8x32xf32>
    %65 = arith.mulf %63, %64 : vector<8x32xf32>
    %66 = arith.maximumf %48, %65 : vector<8x32xf32>
    %67 = tpu.concatenate %65, %65 in 1 : vector<8x32xf32>, vector<8x32xf32> -> vector<8x64xf32>
    %68 = arith.mulf %67, %44 : vector<8x64xf32>
    %69 = vector.extract_strided_slice %10 {offsets = [8, 0], sizes = [8, 128], strides = [1, 1]} : vector<64x128xf32> to vector<8x128xf32>
    %cst_21 = arith.constant dense<0.000000e+00> : vector<8x128xf32>
    %70 = tpu.matmul %68, %45, %cst_21 {dimension_numbers = #tpu.dot_dimension_numbers<[1], [0], [0], [1], [0, 0, 1, 1], [], []>} : vector<8x64xf32>, vector<64x128xf32>, vector<8x128xf32> -> vector<8x128xf32>
    %71 = arith.addf %69, %70 : vector<8x128xf32>
    %72 = math.tanh %71 : vector<8x128xf32>
    %cst_22 = arith.constant 5.000000e-01 : f32
    %73 = vector.broadcast %cst_22 : f32 to vector<8x128xf32>
    %74 = arith.mulf %73, %72 : vector<8x128xf32>
    %cst_23 = arith.constant 5.000000e-01 : f32
    %75 = vector.broadcast %cst_23 : f32 to vector<8x128xf32>
    %76 = arith.addf %74, %75 : vector<8x128xf32>
    %77 = vector.extract_strided_slice %76 {offsets = [0, 32], sizes = [8, 32], strides = [1, 1]} : vector<8x128xf32> to vector<8x32xf32>
    %78 = arith.mulf %77, %62 : vector<8x32xf32>
    %79 = vector.extract_strided_slice %76 {offsets = [0, 0], sizes = [8, 32], strides = [1, 1]} : vector<8x128xf32> to vector<8x32xf32>
    %80 = vector.extract_strided_slice %72 {offsets = [0, 64], sizes = [8, 32], strides = [1, 1]} : vector<8x128xf32> to vector<8x32xf32>
    %81 = arith.mulf %79, %80 : vector<8x32xf32>
    %82 = arith.addf %78, %81 : vector<8x32xf32>
    %83 = vector.extract_strided_slice %76 {offsets = [0, 96], sizes = [8, 32], strides = [1, 1]} : vector<8x128xf32> to vector<8x32xf32>
    %84 = math.tanh %82 : vector<8x32xf32>
    %85 = arith.mulf %83, %84 : vector<8x32xf32>
    %86 = arith.maximumf %66, %85 : vector<8x32xf32>
    %87 = tpu.concatenate %85, %85 in 1 : vector<8x32xf32>, vector<8x32xf32> -> vector<8x64xf32>
    %88 = arith.mulf %87, %44 : vector<8x64xf32>
    %89 = vector.extract_strided_slice %10 {offsets = [16, 0], sizes = [8, 128], strides = [1, 1]} : vector<64x128xf32> to vector<8x128xf32>
    %cst_24 = arith.constant dense<0.000000e+00> : vector<8x128xf32>
    %90 = tpu.matmul %88, %45, %cst_24 {dimension_numbers = #tpu.dot_dimension_numbers<[1], [0], [0], [1], [0, 0, 1, 1], [], []>} : vector<8x64xf32>, vector<64x128xf32>, vector<8x128xf32> -> vector<8x128xf32>
    %91 = arith.addf %89, %90 : vector<8x128xf32>
    %92 = math.tanh %91 : vector<8x128xf32>
    %cst_25 = arith.constant 5.000000e-01 : f32
    %93 = vector.broadcast %cst_25 : f32 to vector<8x128xf32>
    %94 = arith.mulf %93, %92 : vector<8x128xf32>
    %cst_26 = arith.constant 5.000000e-01 : f32
    %95 = vector.broadcast %cst_26 : f32 to vector<8x128xf32>
    %96 = arith.addf %94, %95 : vector<8x128xf32>
    %97 = vector.extract_strided_slice %96 {offsets = [0, 32], sizes = [8, 32], strides = [1, 1]} : vector<8x128xf32> to vector<8x32xf32>
    %98 = arith.mulf %97, %82 : vector<8x32xf32>
    %99 = vector.extract_strided_slice %96 {offsets = [0, 0], sizes = [8, 32], strides = [1, 1]} : vector<8x128xf32> to vector<8x32xf32>
    %100 = vector.extract_strided_slice %92 {offsets = [0, 64], sizes = [8, 32], strides = [1, 1]} : vector<8x128xf32> to vector<8x32xf32>
    %101 = arith.mulf %99, %100 : vector<8x32xf32>
    %102 = arith.addf %98, %101 : vector<8x32xf32>
    %103 = vector.extract_strided_slice %96 {offsets = [0, 96], sizes = [8, 32], strides = [1, 1]} : vector<8x128xf32> to vector<8x32xf32>
    %104 = math.tanh %102 : vector<8x32xf32>
    %105 = arith.mulf %103, %104 : vector<8x32xf32>
    %106 = arith.maximumf %86, %105 : vector<8x32xf32>
    %107 = tpu.concatenate %105, %105 in 1 : vector<8x32xf32>, vector<8x32xf32> -> vector<8x64xf32>
    %108 = arith.mulf %107, %44 : vector<8x64xf32>
    %109 = vector.extract_strided_slice %10 {offsets = [24, 0], sizes = [8, 128], strides = [1, 1]} : vector<64x128xf32> to vector<8x128xf32>
    %cst_27 = arith.constant dense<0.000000e+00> : vector<8x128xf32>
    %110 = tpu.matmul %108, %45, %cst_27 {dimension_numbers = #tpu.dot_dimension_numbers<[1], [0], [0], [1], [0, 0, 1, 1], [], []>} : vector<8x64xf32>, vector<64x128xf32>, vector<8x128xf32> -> vector<8x128xf32>
    %111 = arith.addf %109, %110 : vector<8x128xf32>
    %112 = math.tanh %111 : vector<8x128xf32>
    %cst_28 = arith.constant 5.000000e-01 : f32
    %113 = vector.broadcast %cst_28 : f32 to vector<8x128xf32>
    %114 = arith.mulf %113, %112 : vector<8x128xf32>
    %cst_29 = arith.constant 5.000000e-01 : f32
    %115 = vector.broadcast %cst_29 : f32 to vector<8x128xf32>
    %116 = arith.addf %114, %115 : vector<8x128xf32>
    %117 = vector.extract_strided_slice %116 {offsets = [0, 32], sizes = [8, 32], strides = [1, 1]} : vector<8x128xf32> to vector<8x32xf32>
    %118 = arith.mulf %117, %102 : vector<8x32xf32>
    %119 = vector.extract_strided_slice %116 {offsets = [0, 0], sizes = [8, 32], strides = [1, 1]} : vector<8x128xf32> to vector<8x32xf32>
    %120 = vector.extract_strided_slice %112 {offsets = [0, 64], sizes = [8, 32], strides = [1, 1]} : vector<8x128xf32> to vector<8x32xf32>
    %121 = arith.mulf %119, %120 : vector<8x32xf32>
    %122 = arith.addf %118, %121 : vector<8x32xf32>
    %123 = vector.extract_strided_slice %116 {offsets = [0, 96], sizes = [8, 32], strides = [1, 1]} : vector<8x128xf32> to vector<8x32xf32>
    %124 = math.tanh %122 : vector<8x32xf32>
    %125 = arith.mulf %123, %124 : vector<8x32xf32>
    %126 = arith.maximumf %106, %125 : vector<8x32xf32>
    %127 = tpu.concatenate %125, %125 in 1 : vector<8x32xf32>, vector<8x32xf32> -> vector<8x64xf32>
    %128 = arith.mulf %127, %44 : vector<8x64xf32>
    %129 = vector.extract_strided_slice %10 {offsets = [32, 0], sizes = [8, 128], strides = [1, 1]} : vector<64x128xf32> to vector<8x128xf32>
    %cst_30 = arith.constant dense<0.000000e+00> : vector<8x128xf32>
    %130 = tpu.matmul %128, %45, %cst_30 {dimension_numbers = #tpu.dot_dimension_numbers<[1], [0], [0], [1], [0, 0, 1, 1], [], []>} : vector<8x64xf32>, vector<64x128xf32>, vector<8x128xf32> -> vector<8x128xf32>
    %131 = arith.addf %129, %130 : vector<8x128xf32>
    %132 = math.tanh %131 : vector<8x128xf32>
    %cst_31 = arith.constant 5.000000e-01 : f32
    %133 = vector.broadcast %cst_31 : f32 to vector<8x128xf32>
    %134 = arith.mulf %133, %132 : vector<8x128xf32>
    %cst_32 = arith.constant 5.000000e-01 : f32
    %135 = vector.broadcast %cst_32 : f32 to vector<8x128xf32>
    %136 = arith.addf %134, %135 : vector<8x128xf32>
    %137 = vector.extract_strided_slice %136 {offsets = [0, 32], sizes = [8, 32], strides = [1, 1]} : vector<8x128xf32> to vector<8x32xf32>
    %138 = arith.mulf %137, %122 : vector<8x32xf32>
    %139 = vector.extract_strided_slice %136 {offsets = [0, 0], sizes = [8, 32], strides = [1, 1]} : vector<8x128xf32> to vector<8x32xf32>
    %140 = vector.extract_strided_slice %132 {offsets = [0, 64], sizes = [8, 32], strides = [1, 1]} : vector<8x128xf32> to vector<8x32xf32>
    %141 = arith.mulf %139, %140 : vector<8x32xf32>
    %142 = arith.addf %138, %141 : vector<8x32xf32>
    %143 = vector.extract_strided_slice %136 {offsets = [0, 96], sizes = [8, 32], strides = [1, 1]} : vector<8x128xf32> to vector<8x32xf32>
    %144 = math.tanh %142 : vector<8x32xf32>
    %145 = arith.mulf %143, %144 : vector<8x32xf32>
    %146 = arith.maximumf %126, %145 : vector<8x32xf32>
    %147 = tpu.concatenate %145, %145 in 1 : vector<8x32xf32>, vector<8x32xf32> -> vector<8x64xf32>
    %148 = arith.mulf %147, %44 : vector<8x64xf32>
    %149 = vector.extract_strided_slice %10 {offsets = [40, 0], sizes = [8, 128], strides = [1, 1]} : vector<64x128xf32> to vector<8x128xf32>
    %cst_33 = arith.constant dense<0.000000e+00> : vector<8x128xf32>
    %150 = tpu.matmul %148, %45, %cst_33 {dimension_numbers = #tpu.dot_dimension_numbers<[1], [0], [0], [1], [0, 0, 1, 1], [], []>} : vector<8x64xf32>, vector<64x128xf32>, vector<8x128xf32> -> vector<8x128xf32>
    %151 = arith.addf %149, %150 : vector<8x128xf32>
    %152 = math.tanh %151 : vector<8x128xf32>
    %cst_34 = arith.constant 5.000000e-01 : f32
    %153 = vector.broadcast %cst_34 : f32 to vector<8x128xf32>
    %154 = arith.mulf %153, %152 : vector<8x128xf32>
    %cst_35 = arith.constant 5.000000e-01 : f32
    %155 = vector.broadcast %cst_35 : f32 to vector<8x128xf32>
    %156 = arith.addf %154, %155 : vector<8x128xf32>
    %157 = vector.extract_strided_slice %156 {offsets = [0, 32], sizes = [8, 32], strides = [1, 1]} : vector<8x128xf32> to vector<8x32xf32>
    %158 = arith.mulf %157, %142 : vector<8x32xf32>
    %159 = vector.extract_strided_slice %156 {offsets = [0, 0], sizes = [8, 32], strides = [1, 1]} : vector<8x128xf32> to vector<8x32xf32>
    %160 = vector.extract_strided_slice %152 {offsets = [0, 64], sizes = [8, 32], strides = [1, 1]} : vector<8x128xf32> to vector<8x32xf32>
    %161 = arith.mulf %159, %160 : vector<8x32xf32>
    %162 = arith.addf %158, %161 : vector<8x32xf32>
    %163 = vector.extract_strided_slice %156 {offsets = [0, 96], sizes = [8, 32], strides = [1, 1]} : vector<8x128xf32> to vector<8x32xf32>
    %164 = math.tanh %162 : vector<8x32xf32>
    %165 = arith.mulf %163, %164 : vector<8x32xf32>
    %166 = arith.maximumf %146, %165 : vector<8x32xf32>
    %167 = tpu.concatenate %165, %165 in 1 : vector<8x32xf32>, vector<8x32xf32> -> vector<8x64xf32>
    %168 = arith.mulf %167, %44 : vector<8x64xf32>
    %169 = vector.extract_strided_slice %10 {offsets = [48, 0], sizes = [8, 128], strides = [1, 1]} : vector<64x128xf32> to vector<8x128xf32>
    %cst_36 = arith.constant dense<0.000000e+00> : vector<8x128xf32>
    %170 = tpu.matmul %168, %45, %cst_36 {dimension_numbers = #tpu.dot_dimension_numbers<[1], [0], [0], [1], [0, 0, 1, 1], [], []>} : vector<8x64xf32>, vector<64x128xf32>, vector<8x128xf32> -> vector<8x128xf32>
    %171 = arith.addf %169, %170 : vector<8x128xf32>
    %172 = math.tanh %171 : vector<8x128xf32>
    %cst_37 = arith.constant 5.000000e-01 : f32
    %173 = vector.broadcast %cst_37 : f32 to vector<8x128xf32>
    %174 = arith.mulf %173, %172 : vector<8x128xf32>
    %cst_38 = arith.constant 5.000000e-01 : f32
    %175 = vector.broadcast %cst_38 : f32 to vector<8x128xf32>
    %176 = arith.addf %174, %175 : vector<8x128xf32>
    %177 = vector.extract_strided_slice %176 {offsets = [0, 32], sizes = [8, 32], strides = [1, 1]} : vector<8x128xf32> to vector<8x32xf32>
    %178 = arith.mulf %177, %162 : vector<8x32xf32>
    %179 = vector.extract_strided_slice %176 {offsets = [0, 0], sizes = [8, 32], strides = [1, 1]} : vector<8x128xf32> to vector<8x32xf32>
    %180 = vector.extract_strided_slice %172 {offsets = [0, 64], sizes = [8, 32], strides = [1, 1]} : vector<8x128xf32> to vector<8x32xf32>
    %181 = arith.mulf %179, %180 : vector<8x32xf32>
    %182 = arith.addf %178, %181 : vector<8x32xf32>
    %183 = vector.extract_strided_slice %176 {offsets = [0, 96], sizes = [8, 32], strides = [1, 1]} : vector<8x128xf32> to vector<8x32xf32>
    %184 = math.tanh %182 : vector<8x32xf32>
    %185 = arith.mulf %183, %184 : vector<8x32xf32>
    %186 = arith.maximumf %166, %185 : vector<8x32xf32>
    %187 = tpu.concatenate %185, %185 in 1 : vector<8x32xf32>, vector<8x32xf32> -> vector<8x64xf32>
    %188 = arith.mulf %187, %44 : vector<8x64xf32>
    %189 = vector.extract_strided_slice %10 {offsets = [56, 0], sizes = [8, 128], strides = [1, 1]} : vector<64x128xf32> to vector<8x128xf32>
    %cst_39 = arith.constant dense<0.000000e+00> : vector<8x128xf32>
    %190 = tpu.matmul %188, %45, %cst_39 {dimension_numbers = #tpu.dot_dimension_numbers<[1], [0], [0], [1], [0, 0, 1, 1], [], []>} : vector<8x64xf32>, vector<64x128xf32>, vector<8x128xf32> -> vector<8x128xf32>
    %191 = arith.addf %189, %190 : vector<8x128xf32>
    %192 = math.tanh %191 : vector<8x128xf32>
    %cst_40 = arith.constant 5.000000e-01 : f32
    %193 = vector.broadcast %cst_40 : f32 to vector<8x128xf32>
    %194 = arith.mulf %193, %192 : vector<8x128xf32>
    %cst_41 = arith.constant 5.000000e-01 : f32
    %195 = vector.broadcast %cst_41 : f32 to vector<8x128xf32>
    %196 = arith.addf %194, %195 : vector<8x128xf32>
    %197 = vector.extract_strided_slice %196 {offsets = [0, 32], sizes = [8, 32], strides = [1, 1]} : vector<8x128xf32> to vector<8x32xf32>
    %198 = arith.mulf %197, %182 : vector<8x32xf32>
    %199 = vector.extract_strided_slice %196 {offsets = [0, 0], sizes = [8, 32], strides = [1, 1]} : vector<8x128xf32> to vector<8x32xf32>
    %200 = vector.extract_strided_slice %192 {offsets = [0, 64], sizes = [8, 32], strides = [1, 1]} : vector<8x128xf32> to vector<8x32xf32>
    %201 = arith.mulf %199, %200 : vector<8x32xf32>
    %202 = arith.addf %198, %201 : vector<8x32xf32>
    %203 = vector.extract_strided_slice %196 {offsets = [0, 96], sizes = [8, 32], strides = [1, 1]} : vector<8x128xf32> to vector<8x32xf32>
    %204 = math.tanh %202 : vector<8x32xf32>
    %205 = arith.mulf %203, %204 : vector<8x32xf32>
    %206 = arith.maximumf %186, %205 : vector<8x32xf32>
    %207 = vector.extract_strided_slice %206 {offsets = [0, 0], sizes = [4, 32], strides = [1, 1]} : vector<8x32xf32> to vector<4x32xf32>
    %208 = vector.extract_strided_slice %206 {offsets = [4, 0], sizes = [4, 32], strides = [1, 1]} : vector<8x32xf32> to vector<4x32xf32>
    %cst_42 = arith.constant 1.000000e+00 : f32
    %209 = vector.broadcast %cst_42 : f32 to vector<4x1xf32>
    %210 = tpu.concatenate %28, %207, %208, %209 in 1 : vector<4x32xf32>, vector<4x32xf32>, vector<4x32xf32>, vector<4x1xf32> -> vector<4x97xf32>
    %c0_43 = arith.constant 0 : index
    %c0_44 = arith.constant 0 : index
    %211 = vector.load %arg4[%c0_43, %c0_44] : memref<97x4xf32, #tpu.memory_space<vmem>>, vector<97x4xf32>
    %cst_45 = arith.constant dense<0.000000e+00> : vector<4x4xf32>
    %212 = tpu.matmul %210, %211, %cst_45 {dimension_numbers = #tpu.dot_dimension_numbers<[1], [0], [0], [1], [0, 0, 1, 1], [], []>} : vector<4x97xf32>, vector<97x4xf32>, vector<4x4xf32> -> vector<4x4xf32>
    %cst_46 = arith.constant dense<0xFF800000> : vector<4xf32>
    %213 = vector.multi_reduction <maximumf>, %212, %cst_46 [1] : vector<4x4xf32> to vector<4xf32>
    %214 = vector.shape_cast %213 : vector<4xf32> to vector<4x1xf32>
    %215 = vector.broadcast %214 : vector<4x1xf32> to vector<4x4xf32>
    %216 = arith.subf %212, %215 : vector<4x4xf32>
    %217 = math.exp %216 : vector<4x4xf32>
    %cst_47 = arith.constant dense<0.000000e+00> : vector<4xf32>
    %218 = vector.multi_reduction <add>, %217, %cst_47 [1] : vector<4x4xf32> to vector<4xf32>
    %219 = vector.shape_cast %218 : vector<4xf32> to vector<4x1xf32>
    %220 = tpu.reciprocal %219 : vector<4x1xf32> -> vector<4x1xf32>
    %221 = vector.broadcast %220 : vector<4x1xf32> to vector<4x4xf32>
    %222 = arith.mulf %217, %221 : vector<4x4xf32>
    %c0_48 = arith.constant 0 : index
    %c0_49 = arith.constant 0 : index
    %223 = vector.load %arg5[%c0_48, %c0_49] : memref<4x4xf32, #tpu.memory_space<vmem>>, vector<4x4xf32>
    tpu.vector_store %arg5[%c0_48, %c0_49], %222 {strides = array<i32>} : memref<4x4xf32, #tpu.memory_space<vmem>>, vector<4x4xf32>,
    return
  }
}

</mosaic_0001>

<bundles_post_ra>
// kernel: model_forward.1
= control target key start
LH: loop header
LB: loop body
LE: loop exit
PB: predicated region body
PF: predicated region fallthrough
CT: control target
= control target key end

     0   :  { %vm109_vm0 = vcmask 1043456   ;;  %v877_v3 = vmov 0   ;;  %s1299_s0 = inlined_call_operand.vmem [shape: s32[64,1], index: 0, kind: input, shape index: {}]   ;;  %s1300_s1 = inlined_call_operand.vmem [shape: f32[100,66], index: 1, kind: input, shape index: {}]   ;;  %s1301_s2 = inlined_call_operand.vmem [shape: f32[66,128], index: 2, kind: input, shape index: {}]   ;;  %s1302_s3 = inlined_call_operand.vmem [shape: f32[64,128], index: 3, kind: input, shape index: {}]   ;;  %s1303_s4 = inlined_call_operand.vmem [shape: f32[97,4], index: 4, kind: input, shape index: {}]   ;;  %s1304_s5 = inlined_call_operand.hbm [shape: f32[4,4], index: 5, kind: output, shape index: {}]  }
   0x1   :  { %v21_v0 = vld [vmem:[%s1299_s0] sm:$0xff]  ;;  %v22_v1 = vld [vmem:[%s1299_s0 + $0x8] sm:$0xff]  ;;  %812 = vset.pattern.permute.xlu0 %v877_v3  ;;  %813 = vset.pattern.permute.xlu1 %v877_v3  ;;  %v82_v4 = vld [vmem:[%s1300_s1 + $0x58] sm:$0xff] }
   0x2   :  { %v83_v2 = vld [vmem:[%s1300_s1 + $0x60] sm:$0xf]  ;;  %32 = vperm.xlu0 %812, %v21_v0   ;;  %35 = vperm.xlu1 %813, %v22_v1   ;;  %v81_v5 = vld [vmem:[%s1300_s1 + $0x50] sm:$0xff] }
   0x3   :  { %779 = vmatpush.msk.msra.mxu0 %vm109_vm0, %v83_v2  ;;  %814 = vset.pattern.permute.xlu2 %v877_v3 }
   0x4   :  { %10 = vsyncpa [#allocation3], 0  ;;  %v80_v6 = vld [vmem:[%s1300_s1 + $0x48] sm:$0xff]  ;;  %v79_v7 = vld [vmem:[%s1300_s1 + $0x40] sm:$0xff]  ;;  %vm188_vm1 = vcmask 1041408   ;;  %v29_v32 = vlaneseq  ;;  %v878_v33 = vmov 0.0  }
   0x5   :  { %117 = vmatpush.msra.mxu0 %v82_v4  ;;  %v78_v8 = vld [vmem:[%s1300_s1 + $0x38] sm:$0xff]  ;;  %v77_v9 = vld [vmem:[%s1300_s1 + $0x30] sm:$0xff]  ;;  %v76_v10 = vld [vmem:[%s1300_s1 + $0x28] sm:$0xff]  ;;  %vm84_vm2 = vcmask 818176   ;;  %vm163_vm5 = vcmask 539648   ;;  %s879_s29 = smov 64  }
   0x6   :  { %v75_v11 = vld [vmem:[%s1300_s1 + $0x20] sm:$0xff]  ;;  %v74_v12 = vld [vmem:[%s1300_s1 + $0x18] sm:$0xff]  ;;  %v73_v13 = vld [vmem:[%s1300_s1 + $0x10] sm:$0xff]  ;;  %v1042_v34 = vand.u32 127, %v29_v32  ;;  %v242_v59 = vshrl.u32 %v29_v32, 7  ;;  %vm312_vm14 = vcmask 261120  }
   0x7   :  { %118 = vmatpush.msra.mxu0 %v81_v5  ;;  %v72_v14 = vld [vmem:[%s1300_s1 + $0x8] sm:$0xff]  ;;  %v71_v15 = vld [vmem:[%s1300_s1] sm:$0xff]  ;;  %v961_v16 = vld [vmem:[%s1302_s3 + $0x38] sm:$0xff]  ;;  %vm259_vm15 = vcmask 523264   ;;  %s881_s30 = smov 96   ;;  %s770_s17 = sshll.u32 %s1304_s5, 4  ;;  %s771_s17 = int_to_ptr.hbm [resolvable:$true] %s770_s17 }
   0x8   :  { %v966_v17 = vld [vmem:[%s1302_s3 + $0x30] sm:$0xff]  ;;  %v162_v18 = vld [vmem:[%s1301_s2 + $0x40] sm:$0x3]  ;;  %271 = vmatpush.msra.mxu2 %v961_v16  ;;  %v161_v19 = vld [vmem:[%s1301_s2 + $0x38] sm:$0xff]  ;;  %326 = vmatpush.msra.mxu3 %v961_v16  ;;  %vm243_vm7 = vcmp.lt.s32.totalorder %v242_v59, 4  ;;  %vm244_vm8 = vcmp.lt.s32.totalorder %v1042_v34, 32 }
   0x9   :  { %119 = vmatpush.msra.mxu0 %v80_v6  ;;  %788 = vmatpush.msk.msra.mxu1 %vm188_vm1, %v162_v18  ;;  %v978_v20 = vld [vmem:[%s1302_s3 + $0x28] sm:$0xff]  ;;  %v160_v21 = vld [vmem:[%s1301_s2 + $0x30] sm:$0xff]  ;;  %v988_v22 = vld [vmem:[%s1302_s3 + $0x20] sm:$0xff]  ;;  %vm246_vm9 = vcmp.ge.s32.totalorder %v242_v59, 4  ;;  %vm247_vm10 = vcmp.ge.s32.totalorder %v1042_v34, 32 }
   0xa   :  { %272 = vmatpush.msra.mxu2 %v966_v17  ;;  %v159_v23 = vld [vmem:[%s1301_s2 + $0x28] sm:$0xff]  ;;  %327 = vmatpush.msra.mxu3 %v966_v17  ;;  %v998_v24 = vld [vmem:[%s1302_s3 + $0x18] sm:$0xff]  ;;  %v158_v25 = vld [vmem:[%s1301_s2 + $0x20] sm:$0xff] }
   0xb   :  { %120 = vmatpush.msra.mxu0 %v79_v7  ;;  %200 = vmatpush.msra.mxu1 %v161_v19  ;;  %v1008_v26 = vld [vmem:[%s1302_s3 + $0x10] sm:$0xff]  ;;  %v157_v27 = vld [vmem:[%s1301_s2 + $0x18] sm:$0xff]  ;;  %v1018_v28 = vld [vmem:[%s1302_s3 + $0x8] sm:$0xff] }
   0xc   :  { %273 = vmatpush.msra.mxu2 %v978_v20  ;;  %328 = vmatpush.msra.mxu3 %v978_v20  ;;  %v156_v29 = vld [vmem:[%s1301_s2 + $0x10] sm:$0xff]  ;;  %v1028_v30 = vld [vmem:[%s1302_s3] sm:$0xff]  ;;  %v155_v31 = vld [vmem:[%s1301_s2 + $0x8] sm:$0xff] }
   0xd   :  { %121 = vmatpush.msra.mxu0 %v78_v8  ;;  %201 = vmatpush.msra.mxu1 %v160_v21  ;;  %v154_v39 = vld [vmem:[%s1301_s2] sm:$0xff]  ;;  %s880_s2 = smov 32   ;;  %v23_v56 = vld [vmem:[%s1299_s0 + $0x10] sm:$0xff]  ;;  %vm245_vm11 = vmand %vm243_vm7, %vm244_vm8  ;;  %vm709_vm7 = vcmask 793600   ;;  %vm737_vm8 = vcmask 27648  }
   0xe   :  { %274 = vmatpush.msra.mxu2 %v988_v22  ;;  %329 = vmatpush.msra.mxu3 %v988_v22  ;;  %vm248_vm12 = vmand %vm246_vm9, %vm247_vm10  ;;  %v24_v21 = vld [vmem:[%s1299_s0 + $0x18] sm:$0xff] }
   0xf   :  { %122 = vmatpush.msra.mxu0 %v77_v9  ;;  %202 = vmatpush.msra.mxu1 %v159_v23  ;;  %vm249_vm13 = vmor %vm245_vm11, %vm248_vm12 }
  0x10   :  { %275 = vmatpush.msra.mxu2 %v998_v24  ;;  %330 = vmatpush.msra.mxu3 %v998_v24  ;;  %v1098_v61 = vsel %vm249_vm13, 1.0, %v878_v33 }
  0x11   :  { %123 = vmatpush.msra.mxu0 %v76_v10  ;;  %203 = vmatpush.msra.mxu1 %v158_v25 }
  0x12   :  { %276 = vmatpush.msra.mxu2 %v1008_v26  ;;  %331 = vmatpush.msra.mxu3 %v1008_v26 }
  0x13   :  { %124 = vmatpush.msra.mxu0 %v75_v11  ;;  %204 = vmatpush.msra.mxu1 %v157_v27 }
  0x14   :  { %277 = vmatpush.msra.mxu2 %v1018_v28  ;;  %332 = vmatpush.msra.mxu3 %v1018_v28 }
  0x15   :  { %125 = vmatpush.msra.mxu0 %v74_v12  ;;  %205 = vmatpush.msra.mxu1 %v156_v29 }
  0x16   :  { %278 = vmatpush.msra.mxu2 %v1028_v30  ;;  %333 = vmatpush.msra.mxu3 %v1028_v30 }
  0x17   :  { %126 = vmatpush.msra.mxu0 %v73_v13  ;;  %206 = vmatpush.msra.mxu1 %v155_v31 }
  0x18   :  { %279 = vmatmul.f32.vlgmr.msra.gmra.mxu2 %v878_v33  ;;  %434 = vmatpush.msrb.mxu3 %v961_v16 }
  0x19   :  { %127 = vmatpush.msra.mxu0 %v72_v14  ;;  %380 = vmatpush.msrb.mxu2 %v961_v16 }
  0x1a   :  { %435 = vmatpush.msrb.mxu3 %v966_v17  ;;  %207 = vmatpush.msra.mxu1 %v154_v39 }
  0x1b   :  { %128 = vmatpush.msra.mxu0 %v71_v15  ;;  %381 = vmatpush.msrb.mxu2 %v966_v17 }
  0x1c   :  { %436 = vmatpush.msrb.mxu3 %v978_v20 }
  0x1d   :  { %382 = vmatpush.msrb.mxu2 %v978_v20 }
  0x1e   :  { %437 = vmatpush.msrb.mxu3 %v988_v22 }
  0x1f   :  { %383 = vmatpush.msrb.mxu2 %v988_v22 }
  0x20   :  { %438 = vmatpush.msrb.mxu3 %v998_v24 }
  0x21   :  { %384 = vmatpush.msrb.mxu2 %v998_v24 }
  0x22   :  { %439 = vmatpush.msrb.mxu3 %v1008_v26 }
  0x23   :  { %385 = vmatpush.msrb.mxu2 %v1008_v26 }
  0x24   :  { %440 = vmatpush.msrb.mxu3 %v1018_v28 }
  0x25   :  { %386 = vmatpush.msrb.mxu2 %v1018_v28 }
  0x26   :  { %441 = vmatpush.msrb.mxu3 %v1028_v30 }
  0x27   :  { %387 = vmatpush.msrb.mxu2 %v1028_v30 }
  0x29   :  { %488 = vmatpush.msra.mxu2 %v961_v16 }
  0x2b   :  { %489 = vmatpush.msra.mxu2 %v966_v17 }
  0x2d   :  { %490 = vmatpush.msra.mxu2 %v978_v20 }
  0x2f   :  { %491 = vmatpush.msra.mxu2 %v988_v22 }
  0x31   :  { %492 = vmatpush.msra.mxu2 %v998_v24 }
  0x33   :  { %493 = vmatpush.msra.mxu2 %v1008_v26 }
  0x35   :  { %494 = vmatpush.msra.mxu2 %v1018_v28 }
  0x37   :  { %495 = vmatpush.msra.mxu2 %v1028_v30 }
  0x74   :  { %v33_v35 = vpop.permute.xlu0 %32  ;;  %v36_v37 = vpop.permute.xlu1 %35 }
  0x75   :  { %vm55_vm3 = vcmp.eq.s32.totalorder %v33_v35, %v1042_v34  ;;  %vm56_vm4 = vcmp.eq.s32.totalorder %v36_v37, %v1042_v34 }
  0x76   :  { %v63_v36 = vsel %vm55_vm3, 1.0, %v878_v33  ;;  %v64_v38 = vsel %vm56_vm4, 1.0, %v878_v33 }
  0x77   :  { %780 = vmatmul.msk.f32.vlgmr.msra.gmra.mxu0 %vm84_vm2, %v63_v36 }
  0x7f   :  { %781 = vmatmul.msk.f32.gmra.mxu0 %vm84_vm2, %v64_v38 }
  0x9b   :  { %v280_v42 = vpop.f32.mrf.mxu2 }
  0xf4   :  { %v1075_v40 = vpop.f32.mrf.mxu0 }
  0xf5   :  { %789 = vmatmul.msk.f32.vlgmr.msra.gmra.mxu1 %vm163_vm5, %v1075_v40 }
  0xfc   :  { %v1079_v41 = vpop.f32.mrf.mxu0 }
  0xfd   :  { %790 = vmatmul.msk.f32.gmra.mxu1 %vm163_vm5, %v1079_v41 }
 0x172   :  { %v209_v43 = vpop.f32.mrf.mxu1 }
 0x173   :  { %v283_v44 = vadd.f32 %v280_v42, %v209_v43 }
 0x175   :  { %815 = vtanh.f32 %v283_v44 }
 0x17a   :  { %v212_v2 = vpop.f32.mrf.mxu1 }
 0x17b   :  { %v816_v45 = vpop.eup %815 }
 0x17c   :  { %289 = vrot.lane.b32.xlu0 %v816_v45, %s879_s29  ;;  %v285_v46 = vmul.f32 0.5, %v816_v45 }
 0x17e   :  { %v286_v47 = vadd.f32 0.5, %v285_v46 }
 0x180   :  { %v287_v50 = vmul.f32 0.0, %v286_v47 }
 0x1ee   :  { %v290_v48 = vpop.permute.xlu0 %289 }
 0x1ef   :  { %v292_v49 = vmul.f32 %v290_v48, %v286_v47 }
 0x1f1   :  { %294 = vrot.lane.b32.xlu1 %v292_v49, %s880_s2 }
 0x263   :  { %v295_v51 = vpop.permute.xlu1 %294 }
 0x264   :  { %v297_v52 = vadd.f32 %v295_v51, %v287_v50 }
 0x266   :  { %817 = vtanh.f32 %v297_v52 }
 0x26c   :  { %v818_v53 = vpop.eup %817 }
 0x26d   :  { %300 = vrot.lane.b32.xlu2 %v818_v53, %s879_s29  ;;  %v25_v53 = vld [vmem:[%s1299_s0 + $0x20] sm:$0xff] }
 0x2c7   :  { %v301_v54 = vpop.permute.xlu2 %300 }
 0x2c8   :  { %v303_v55 = vmul.f32 %v301_v54, %v286_v47 }
 0x2ca   :  { %309 = vrot.lane.b32.xlu0 %v303_v55, %s879_s29  ;;  %306 = vrot.lane.b32.xlu2 %v303_v55, %s880_s2  ;;  %v304_v15 = vmax.f32 %v303_v55, 0.0 }
 0x2d2   :  { %38 = vperm.xlu2 %814, %v23_v56  }
 0x324   :  { %v307_v57 = vpop.permute.xlu2 %306 }
 0x32c   :  { %v39_v58 = vpop.permute.xlu2 %38 }
 0x32d   :  { %vm57_vm6 = vcmp.eq.s32.totalorder %v39_v58, %v1042_v34 }
 0x32e   :  { %v65_v60 = vsel %vm57_vm6, 1.0, %v878_v33 }
 0x32f   :  { %782 = vmatmul.msk.f32.gmra.mxu0 %vm84_vm2, %v65_v60 }
 0x33c   :  { %v310_v62 = vpop.permute.xlu0 %309 }
 0x33d   :  { %v313_v63 = vsel %vm312_vm14, %v307_v57, %v310_v62 }
 0x33e   :  { %v314_v0 = vmul.f32 %v313_v63, %v1098_v61 }
 0x340   :  { %797 = vmatmul.msk.f32.vlgmr.msra.gmra.mxu3 %vm259_vm15, %v314_v0 }
 0x341   :  { %542 = vmatpush.msra.mxu3 %v961_v16 }
 0x343   :  { %543 = vmatpush.msra.mxu3 %v966_v17 }
 0x345   :  { %544 = vmatpush.msra.mxu3 %v978_v20 }
 0x347   :  { %545 = vmatpush.msra.mxu3 %v988_v22 }
 0x349   :  { %546 = vmatpush.msra.mxu3 %v998_v24 }
 0x34b   :  { %547 = vmatpush.msra.mxu3 %v1008_v26 }
 0x34d   :  { %548 = vmatpush.msra.mxu3 %v1018_v28 }
 0x34f   :  { %549 = vmatpush.msra.mxu3 %v1028_v30 }
 0x3ac   :  { %v1111_v1 = vpop.f32.mrf.mxu0 }
 0x3ad   :  { %791 = vmatmul.msk.f32.gmra.mxu1 %vm163_vm5, %v1111_v1 }
 0x3c3   :  { %v335_v3 = vpop.f32.mrf.mxu3 }
 0x3c4   :  { %v338_v4 = vadd.f32 %v335_v3, %v212_v2 }
 0x3c6   :  { %819 = vtanh.f32 %v338_v4 }
 0x3cc   :  { %v820_v5 = vpop.eup %819 }
 0x3cd   :  { %344 = vrot.lane.b32.xlu1 %v820_v5, %s879_s29  ;;  %v340_v6 = vmul.f32 0.5, %v820_v5 }
 0x3cf   :  { %v341_v7 = vadd.f32 0.5, %v340_v6  ;;  %v26_v6 = vld [vmem:[%s1299_s0 + $0x28] sm:$0xff] }
 0x3d1   :  { %v342_v10 = vmul.f32 %v341_v7, %v297_v52 }
 0x42a   :  { %v215_v36 = vpop.f32.mrf.mxu1 }
 0x43f   :  { %v345_v8 = vpop.permute.xlu1 %344 }
 0x440   :  { %v347_v9 = vmul.f32 %v345_v8, %v341_v7 }
 0x442   :  { %349 = vrot.lane.b32.xlu0 %v347_v9, %s880_s2 }
 0x4b4   :  { %v350_v11 = vpop.permute.xlu0 %349 }
 0x4b5   :  { %v352_v12 = vadd.f32 %v350_v11, %v342_v10 }
 0x4b7   :  { %821 = vtanh.f32 %v352_v12 }
 0x4bd   :  { %v822_v13 = vpop.eup %821 }
 0x4be   :  { %355 = vrot.lane.b32.xlu1 %v822_v13, %s879_s29 }
 0x530   :  { %v356_v14 = vpop.permute.xlu1 %355 }
 0x531   :  { %v358_v18 = vmul.f32 %v356_v14, %v341_v7 }
 0x533   :  { %v1118_v19 = vmax.f32 %v304_v15, %v358_v18  ;;  %364 = vrot.lane.b32.xlu0 %v358_v18, %s879_s29  ;;  %361 = vrot.lane.b32.xlu2 %v358_v18, %s880_s2 }
 0x53b   :  { %41 = vperm.xlu2 %814, %v24_v21  }
 0x58d   :  { %v362_v23 = vpop.permute.xlu2 %361 }
 0x595   :  { %v42_v25 = vpop.permute.xlu2 %41 }
 0x596   :  { %vm58_vm0 = vcmp.eq.s32.totalorder %v42_v25, %v1042_v34 }
 0x597   :  { %v66_v27 = vsel %vm58_vm0, 1.0, %v878_v33 }
 0x598   :  { %783 = vmatmul.msk.f32.gmra.mxu0 %vm84_vm2, %v66_v27 }
 0x5a5   :  { %v365_v29 = vpop.permute.xlu0 %364 }
 0x5a6   :  { %v367_v31 = vsel %vm312_vm14, %v362_v23, %v365_v29 }
 0x5a7   :  { %v368_v32 = vmul.f32 %v367_v31, %v1098_v61 }
 0x5a9   :  { %798 = vmatmul.msk.f32.vlgmr.msrb.gmra.mxu2 %vm259_vm15, %v368_v32 }
 0x5aa   :  { %596 = vmatpush.msrb.mxu2 %v961_v16 }
 0x5ac   :  { %597 = vmatpush.msrb.mxu2 %v966_v17 }
 0x5ae   :  { %598 = vmatpush.msrb.mxu2 %v978_v20 }
 0x5b0   :  { %599 = vmatpush.msrb.mxu2 %v988_v22 }
 0x5b2   :  { %600 = vmatpush.msrb.mxu2 %v998_v24 }
 0x5b4   :  { %601 = vmatpush.msrb.mxu2 %v1008_v26 }
 0x5b6   :  { %602 = vmatpush.msrb.mxu2 %v1018_v28 }
 0x5b8   :  { %603 = vmatpush.msrb.mxu2 %v1028_v30 }
 0x615   :  { %v1139_v35 = vpop.f32.mrf.mxu0 }
 0x616   :  { %792 = vmatmul.msk.f32.gmra.mxu1 %vm163_vm5, %v1139_v35 }
 0x62c   :  { %v389_v37 = vpop.f32.mrf.mxu2 }
 0x62d   :  { %v392_v38 = vadd.f32 %v389_v37, %v215_v36 }
 0x62f   :  { %823 = vtanh.f32 %v392_v38 }
 0x635   :  { %v824_v39 = vpop.eup %823 }
 0x636   :  { %398 = vrot.lane.b32.xlu1 %v824_v39, %s879_s29  ;;  %v394_v42 = vmul.f32 0.5, %v824_v39 }
 0x638   :  { %v395_v43 = vadd.f32 0.5, %v394_v42  ;;  %v27_v42 = vld [vmem:[%s1299_s0 + $0x30] sm:$0xff] }
 0x63a   :  { %v396_v46 = vmul.f32 %v395_v43, %v352_v12 }
 0x6a8   :  { %v399_v44 = vpop.permute.xlu1 %398 }
 0x6a9   :  { %v401_v45 = vmul.f32 %v399_v44, %v395_v43 }
 0x6ab   :  { %403 = vrot.lane.b32.xlu0 %v401_v45, %s880_s2 }
 0x71d   :  { %v404_v47 = vpop.permute.xlu0 %403 }
 0x71e   :  { %v406_v48 = vadd.f32 %v404_v47, %v396_v46 }
 0x720   :  { %825 = vtanh.f32 %v406_v48 }
 0x726   :  { %v826_v49 = vpop.eup %825 }
 0x727   :  { %409 = vrot.lane.b32.xlu1 %v826_v49, %s879_s29 }
 0x799   :  { %v410_v50 = vpop.permute.xlu1 %409 }
 0x79a   :  { %v412_v51 = vmul.f32 %v410_v50, %v395_v43 }
 0x79c   :  { %v413_v52 = vmax.f32 %v1118_v19, %v412_v51  ;;  %418 = vrot.lane.b32.xlu0 %v412_v51, %s879_s29  ;;  %415 = vrot.lane.b32.xlu2 %v412_v51, %s880_s2 }
 0x7a4   :  { %44 = vperm.xlu2 %814, %v25_v53  }
 0x7f6   :  { %v416_v54 = vpop.permute.xlu2 %415 }
 0x7fe   :  { %v45_v55 = vpop.permute.xlu2 %44 }
 0x7ff   :  { %vm59_vm1 = vcmp.eq.s32.totalorder %v45_v55, %v1042_v34 }
 0x800   :  { %v67_v56 = vsel %vm59_vm1, 1.0, %v878_v33 }
 0x801   :  { %784 = vmatmul.msk.f32.gmra.mxu0 %vm84_vm2, %v67_v56 }
 0x80e   :  { %v419_v57 = vpop.permute.xlu0 %418 }
 0x80f   :  { %v421_v58 = vsel %vm312_vm14, %v416_v54, %v419_v57 }
 0x810   :  { %v422_v59 = vmul.f32 %v421_v58, %v1098_v61 }
 0x812   :  { %799 = vmatmul.msk.f32.vlgmr.msrb.gmra.mxu3 %vm259_vm15, %v422_v59 }
 0x813   :  { %650 = vmatpush.msrb.mxu3 %v961_v16  ;;  %v218_v16 = vpop.f32.mrf.mxu1 }
 0x815   :  { %651 = vmatpush.msrb.mxu3 %v966_v17 }
 0x817   :  { %652 = vmatpush.msrb.mxu3 %v978_v20 }
 0x819   :  { %653 = vmatpush.msrb.mxu3 %v988_v22 }
 0x81b   :  { %654 = vmatpush.msrb.mxu3 %v998_v24 }
 0x81d   :  { %655 = vmatpush.msrb.mxu3 %v1008_v26 }
 0x81f   :  { %656 = vmatpush.msrb.mxu3 %v1018_v28 }
 0x821   :  { %657 = vmatpush.msrb.mxu3 %v1028_v30 }
 0x87e   :  { %v1166_v60 = vpop.f32.mrf.mxu0 }
 0x87f   :  { %793 = vmatmul.msk.f32.gmra.mxu1 %vm163_vm5, %v1166_v60 }
 0x895   :  { %v443_v62 = vpop.f32.mrf.mxu3 }
 0x896   :  { %v446_v17 = vadd.f32 %v443_v62, %v218_v16 }
 0x898   :  { %827 = vtanh.f32 %v446_v17 }
 0x89e   :  { %v828_v20 = vpop.eup %827 }
 0x89f   :  { %452 = vrot.lane.b32.xlu1 %v828_v20, %s879_s29  ;;  %v448_v22 = vmul.f32 0.5, %v828_v20 }
 0x8a1   :  { %v449_v24 = vadd.f32 0.5, %v448_v22 }
 0x8a3   :  { %v450_v28 = vmul.f32 %v449_v24, %v406_v48 }
 0x8fc   :  { %v221_v14 = vpop.f32.mrf.mxu1 }
 0x911   :  { %v453_v63 = vpop.permute.xlu1 %452 }
 0x912   :  { %v455_v26 = vmul.f32 %v453_v63, %v449_v24 }
 0x914   :  { %457 = vrot.lane.b32.xlu0 %v455_v26, %s880_s2 }
 0x986   :  { %v458_v30 = vpop.permute.xlu0 %457 }
 0x987   :  { %v460_v0 = vadd.f32 %v458_v30, %v450_v28 }
 0x989   :  { %829 = vtanh.f32 %v460_v0 }
 0x98f   :  { %v830_v2 = vpop.eup %829 }
 0x990   :  { %463 = vrot.lane.b32.xlu1 %v830_v2, %s879_s29 }
 0xa02   :  { %v464_v3 = vpop.permute.xlu1 %463 }
 0xa03   :  { %v466_v4 = vmul.f32 %v464_v3, %v449_v24  ;;  %v28_v24 = vld [vmem:[%s1299_s0 + $0x38] sm:$0xff]  ;;  %v233_v3 = vmax.f32 %v1075_v40, %v1079_v41 }
 0xa05   :  { %v1173_v5 = vmax.f32 %v413_v52, %v466_v4  ;;  %472 = vrot.lane.b32.xlu0 %v466_v4, %s879_s29  ;;  %469 = vrot.lane.b32.xlu2 %v466_v4, %s880_s2  ;;  %v234_v4 = vmax.f32 %v233_v3, %v1111_v1 }
 0xa0d   :  { %47 = vperm.xlu2 %814, %v26_v6  }
 0xa5f   :  { %v470_v7 = vpop.permute.xlu2 %469 }
 0xa67   :  { %v48_v8 = vpop.permute.xlu2 %47 }
 0xa68   :  { %vm60_vm3 = vcmp.eq.s32.totalorder %v48_v8, %v1042_v34 }
 0xa69   :  { %v68_v9 = vsel %vm60_vm3, 1.0, %v878_v33 }
 0xa6a   :  { %785 = vmatmul.msk.f32.gmra.mxu0 %vm84_vm2, %v68_v9 }
 0xa77   :  { %v473_v10 = vpop.permute.xlu0 %472 }
 0xa78   :  { %v475_v11 = vsel %vm312_vm14, %v470_v7, %v473_v10 }
 0xa79   :  { %v476_v12 = vmul.f32 %v475_v11, %v1098_v61 }
 0xa7b   :  { %800 = vmatmul.msk.f32.vlgmr.msra.gmra.mxu2 %vm259_vm15, %v476_v12 }
 0xae7   :  { %v1186_v13 = vpop.f32.mrf.mxu0 }
 0xae8   :  { %794 = vmatmul.msk.f32.gmra.mxu1 %vm163_vm5, %v1186_v13 }
 0xafe   :  { %v497_v15 = vpop.f32.mrf.mxu2 }
 0xaff   :  { %v500_v18 = vadd.f32 %v497_v15, %v221_v14 }
 0xb01   :  { %831 = vtanh.f32 %v500_v18 }
 0xb07   :  { %v832_v19 = vpop.eup %831 }
 0xb08   :  { %506 = vrot.lane.b32.xlu1 %v832_v19, %s879_s29  ;;  %v502_v21 = vmul.f32 0.5, %v832_v19 }
 0xb0a   :  { %v503_v23 = vadd.f32 0.5, %v502_v21 }
 0xb0c   :  { %v504_v29 = vmul.f32 %v503_v23, %v460_v0 }
 0xb65   :  { %v224_v50 = vpop.f32.mrf.mxu1 }
 0xb7a   :  { %v507_v25 = vpop.permute.xlu1 %506 }
 0xb7b   :  { %v509_v27 = vmul.f32 %v507_v25, %v503_v23 }
 0xb7d   :  { %511 = vrot.lane.b32.xlu0 %v509_v27, %s880_s2 }
 0xbef   :  { %v512_v31 = vpop.permute.xlu0 %511 }
 0xbf0   :  { %v514_v32 = vadd.f32 %v512_v31, %v504_v29 }
 0xbf2   :  { %833 = vtanh.f32 %v514_v32 }
 0xbf8   :  { %v834_v36 = vpop.eup %833 }
 0xbf9   :  { %517 = vrot.lane.b32.xlu1 %v834_v36, %s879_s29 }
 0xc6b   :  { %v518_v37 = vpop.permute.xlu1 %517 }
 0xc6c   :  { %v520_v38 = vmul.f32 %v518_v37, %v503_v23 }
 0xc6e   :  { %v521_v39 = vmax.f32 %v1173_v5, %v520_v38  ;;  %526 = vrot.lane.b32.xlu0 %v520_v38, %s879_s29  ;;  %523 = vrot.lane.b32.xlu2 %v520_v38, %s880_s2  ;;  %v235_v5 = vmax.f32 %v234_v4, %v1139_v35 }
 0xc76   :  { %50 = vperm.xlu2 %814, %v27_v42  }
 0xcc8   :  { %v524_v43 = vpop.permute.xlu2 %523 }
 0xcd0   :  { %v51_v44 = vpop.permute.xlu2 %50 }
 0xcd1   :  { %vm61_vm4 = vcmp.eq.s32.totalorder %v51_v44, %v1042_v34 }
 0xcd2   :  { %v69_v45 = vsel %vm61_vm4, 1.0, %v878_v33 }
 0xcd3   :  { %786 = vmatmul.msk.f32.gmra.mxu0 %vm84_vm2, %v69_v45 }
 0xce0   :  { %v527_v46 = vpop.permute.xlu0 %526 }
 0xce1   :  { %v529_v47 = vsel %vm312_vm14, %v524_v43, %v527_v46 }
 0xce2   :  { %v530_v48 = vmul.f32 %v529_v47, %v1098_v61  ;;  %v708_v47 = vld [vmem:[%s1303_s4 + $0x60] sm:$0x1] }
 0xce4   :  { %801 = vmatmul.msk.f32.vlgmr.msra.gmra.mxu3 %vm259_vm15, %v530_v48  ;;  %v707_v48 = vld [vmem:[%s1303_s4 + $0x58] sm:$0xff] }
 0xd50   :  { %v148_v49 = vpop.f32.mrf.mxu0 }
 0xd51   :  { %795 = vmatmul.msk.f32.gmra.mxu1 %vm163_vm5, %v148_v49 }
 0xd67   :  { %v551_v51 = vpop.f32.mrf.mxu3 }
 0xd68   :  { %v554_v52 = vadd.f32 %v551_v51, %v224_v50  ;;  %v705_v50 = vld [vmem:[%s1303_s4 + $0x48] sm:$0xff]  ;;  %v704_v51 = vld [vmem:[%s1303_s4 + $0x40] sm:$0xff] }
 0xd6a   :  { %835 = vtanh.f32 %v554_v52  ;;  %v703_v52 = vld [vmem:[%s1303_s4 + $0x38] sm:$0xff] }
 0xd70   :  { %v836_v53 = vpop.eup %835 }
 0xd71   :  { %560 = vrot.lane.b32.xlu1 %v836_v53, %s879_s29  ;;  %v556_v54 = vmul.f32 0.5, %v836_v53  ;;  %v702_v53 = vld [vmem:[%s1303_s4 + $0x30] sm:$0xff] }
 0xd73   :  { %v557_v55 = vadd.f32 0.5, %v556_v54  ;;  %v701_v54 = vld [vmem:[%s1303_s4 + $0x28] sm:$0xff] }
 0xd75   :  { %v558_v58 = vmul.f32 %v557_v55, %v514_v32 }
 0xdce   :  { %v227_v9 = vpop.f32.mrf.mxu1 }
 0xde3   :  { %v561_v56 = vpop.permute.xlu1 %560 }
 0xde4   :  { %v563_v57 = vmul.f32 %v561_v56, %v557_v55 }
 0xde6   :  { %565 = vrot.lane.b32.xlu0 %v563_v57, %s880_s2 }
 0xe58   :  { %v566_v59 = vpop.permute.xlu0 %565 }
 0xe59   :  { %v568_v16 = vadd.f32 %v566_v59, %v558_v58  ;;  %v700_v59 = vld [vmem:[%s1303_s4 + $0x20] sm:$0xff] }
 0xe5b   :  { %837 = vtanh.f32 %v568_v16 }
 0xe61   :  { %v838_v62 = vpop.eup %837 }
 0xe62   :  { %571 = vrot.lane.b32.xlu1 %v838_v62, %s879_s29  ;;  %v698_v62 = vld [vmem:[%s1303_s4 + $0x10] sm:$0xff] }
 0xed4   :  { %v572_v17 = vpop.permute.xlu1 %571 }
 0xed5   :  { %v574_v20 = vmul.f32 %v572_v17, %v557_v55  ;;  %v697_v17 = vld [vmem:[%s1303_s4 + $0x8] sm:$0xff] }
 0xed7   :  { %v1209_v22 = vmax.f32 %v521_v39, %v574_v20  ;;  %580 = vrot.lane.b32.xlu0 %v574_v20, %s879_s29  ;;  %577 = vrot.lane.b32.xlu2 %v574_v20, %s880_s2  ;;  %v696_v20 = vld [vmem:[%s1303_s4] sm:$0xff] }
 0xedf   :  { %53 = vperm.xlu2 %814, %v28_v24  }
 0xf31   :  { %v578_v63 = vpop.permute.xlu2 %577 }
 0xf39   :  { %v54_v26 = vpop.permute.xlu2 %53 }
 0xf3a   :  { %vm62_vm6 = vcmp.eq.s32.totalorder %v54_v26, %v1042_v34  ;;  %v236_v34 = vmax.f32 %v235_v5, %v1166_v60 }
 0xf3b   :  { %v70_v28 = vsel %vm62_vm6, 1.0, %v878_v33 }
 0xf3c   :  { %787 = vmatmul.msk.f32.gmra.mxu0 %vm84_vm2, %v70_v28  ;;  %v237_v33 = vmax.f32 %v236_v34, %v1186_v13  ;;  %vm713_vm2 = vcmask 1040384  }
 0xf3d   :  { %804 = vmatpush.msk.msrb.mxu1 %vm713_vm2, %v708_v47 }
 0xf3e   :  { %v1228_v6 = vmax.f32 %v237_v33, %v148_v49  ;;  %v706_v49 = vld [vmem:[%s1303_s4 + $0x50] sm:$0xff] }
 0xf3f   :  { %721 = vmatpush.msrb.mxu1 %v707_v48 }
 0xf41   :  { %722 = vmatpush.msrb.mxu1 %v706_v49 }
 0xf43   :  { %723 = vmatpush.msrb.mxu1 %v705_v50 }
 0xf45   :  { %724 = vmatpush.msrb.mxu1 %v704_v51 }
 0xf47   :  { %725 = vmatpush.msrb.mxu1 %v703_v52 }
 0xf49   :  { %v581_v30 = vpop.permute.xlu0 %580  ;;  %726 = vmatpush.msrb.mxu1 %v702_v53 }
 0xf4a   :  { %v583_v0 = vsel %vm312_vm14, %v578_v63, %v581_v30 }
 0xf4b   :  { %v584_v2 = vmul.f32 %v583_v0, %v1098_v61  ;;  %727 = vmatpush.msrb.mxu1 %v701_v54 }
 0xf4d   :  { %802 = vmatmul.msk.f32.vlgmr.msrb.gmra.mxu2 %vm259_vm15, %v584_v2  ;;  %728 = vmatpush.msrb.mxu1 %v700_v59 }
 0xfb9   :  { %v1230_v7 = vpop.f32.mrf.mxu0 }
 0xfba   :  { %v239_v8 = vmax.f32 %v1228_v6, %v1230_v7  ;;  %796 = vmatmul.msk.f32.gmra.mxu1 %vm163_vm5, %v1230_v7  ;;  %vm694_vm5 = vcmask 785408  }
 0xfd0   :  { %v605_v40 = vpop.f32.mrf.mxu2 }
 0xfd1   :  { %v608_v41 = vadd.f32 %v605_v40, %v227_v9 }
 0xfd3   :  { %839 = vtanh.f32 %v608_v41 }
 0xfd9   :  { %v840_v1 = vpop.eup %839 }
 0xfda   :  { %614 = vrot.lane.b32.xlu1 %v840_v1, %s879_s29  ;;  %v610_v35 = vmul.f32 0.5, %v840_v1 }
 0xfdc   :  { %v611_v60 = vadd.f32 0.5, %v610_v35 }
 0xfde   :  { %v612_v12 = vmul.f32 %v611_v60, %v568_v16  ;;  %v699_v16 = vld [vmem:[%s1303_s4 + $0x18] sm:$0xff]  ;;  %s882_s4 = smov [#allocation2]  }
 0xfdf   :  { %729 = vmatpush.msrb.mxu1 %v699_v16  ;;  %s768_s15 = sshll.u32 %s882_s4, 4  ;;  %s769_s15 = int_to_ptr.vmem [resolvable:$true] %s768_s15 }
 0xfe1   :  { %730 = vmatpush.msrb.mxu1 %v698_v62 }
 0xfe3   :  { %731 = vmatpush.msrb.mxu1 %v697_v17 }
 0xfe5   :  { %732 = vmatpush.msrb.mxu1 %v696_v20 }
0x1037   :  { %v230_v31 = vpop.f32.mrf.mxu1 }
0x104c   :  { %v615_v10 = vpop.permute.xlu1 %614 }
0x104d   :  { %v617_v11 = vmul.f32 %v615_v10, %v611_v60 }
0x104f   :  { %619 = vrot.lane.b32.xlu0 %v617_v11, %s880_s2 }
0x10c1   :  { %v620_v13 = vpop.permute.xlu0 %619 }
0x10c2   :  { %v622_v14 = vadd.f32 %v620_v13, %v612_v12 }
0x10c4   :  { %841 = vtanh.f32 %v622_v14 }
0x10ca   :  { %v842_v15 = vpop.eup %841 }
0x10cb   :  { %625 = vrot.lane.b32.xlu1 %v842_v15, %s879_s29 }
0x113d   :  { %v626_v18 = vpop.permute.xlu1 %625 }
0x113e   :  { %v628_v19 = vmul.f32 %v626_v18, %v611_v60 }
0x1140   :  { %634 = vrot.lane.b32.xlu0 %v628_v19, %s879_s29  ;;  %631 = vrot.lane.b32.xlu2 %v628_v19, %s880_s2  ;;  %v629_v21 = vmax.f32 %v1209_v22, %v628_v19  ;;  %v240_v22 = vmax.f32 %v239_v8, 0.0 }
0x119a   :  { %v632_v23 = vpop.permute.xlu2 %631 }
0x11b2   :  { %v635_v25 = vpop.permute.xlu0 %634 }
0x11b3   :  { %v637_v27 = vsel %vm312_vm14, %v632_v23, %v635_v25 }
0x11b4   :  { %v638_v29 = vmul.f32 %v637_v27, %v1098_v61 }
0x11b6   :  { %803 = vmatmul.msk.f32.vlgmr.msrb.gmra.mxu3 %vm259_vm15, %v638_v29 }
0x1239   :  { %v659_v32 = vpop.f32.mrf.mxu3 }
0x123a   :  { %v662_v36 = vadd.f32 %v659_v32, %v230_v31 }
0x123c   :  { %843 = vtanh.f32 %v662_v36 }
0x1242   :  { %v844_v37 = vpop.eup %843 }
0x1243   :  { %668 = vrot.lane.b32.xlu1 %v844_v37, %s879_s29  ;;  %v664_v38 = vmul.f32 0.5, %v844_v37 }
0x1245   :  { %v665_v39 = vadd.f32 0.5, %v664_v38 }
0x1247   :  { %v666_v44 = vmul.f32 %v665_v39, %v622_v14 }
0x12b5   :  { %v669_v42 = vpop.permute.xlu1 %668 }
0x12b6   :  { %v671_v43 = vmul.f32 %v669_v42, %v665_v39 }
0x12b8   :  { %673 = vrot.lane.b32.xlu2 %v671_v43, %s880_s2 }
0x1312   :  { %v674_v45 = vpop.permute.xlu2 %673 }
0x1313   :  { %v676_v46 = vadd.f32 %v674_v45, %v666_v44 }
0x1315   :  { %845 = vtanh.f32 %v676_v46 }
0x131b   :  { %v846_v61 = vpop.eup %845 }
0x131c   :  { %679 = vrot.lane.b32.xlu0 %v846_v61, %s879_s29 }
0x138e   :  { %v680_v55 = vpop.permute.xlu0 %679 }
0x138f   :  { %v682_v56 = vmul.f32 %v680_v55, %v665_v39 }
0x1391   :  { %v683_v57 = vmax.f32 %v629_v21, %v682_v56 }
0x1393   :  { %685 = vrot.lane.b32.xlu1 %v683_v57, %s879_s29  ;;  %v688_v58 = vrot.slane %v683_v57, 4 }
0x1395   :  { %689 = vrot.lane.b32.xlu2 %v688_v58, %s881_s30 }
0x13ef   :  { %v690_v63 = vpop.permute.xlu2 %689 }
0x1405   :  { %v686_v24 = vpop.permute.xlu1 %685 }
0x1406   :  { %v692_v26 = vsel %vm312_vm14, %v240_v22, %v686_v24 }
0x1407   :  { %v693_v28 = vsel %vm259_vm15, %v692_v26, %v690_v63 }
0x1408   :  { %v695_v30 = vsel %vm694_vm5, %v693_v28, 1.0 }
0x1409   :  { %805 = vmatmul.msk.f32.vlgmr.msrb.gmra.mxu1 %vm709_vm7, %v695_v30 }
0x1486   :  { %v734_v0 = vpop.f32.mrf.mxu1 }
0x1487   :  { %v738_v2 = vsel %vm737_vm8, %v734_v0, -inf }
0x1488   :  { %739 = vmax.xlane.f32.xlu0 %v738_v2 }
0x14fb   :  { %v740_v3 = vpop.xlane.xlu0 %739 }
0x14fc   :  { %v741_v4 = vsub.f32 %v734_v0, %v740_v3 }
0x14fe   :  { %v742_v5 = vmul.f32 1.442695, %v741_v4 }
0x1500   :  { %847 = vpow2.f32 %v742_v5 }
0x1506   :  { %v848_v34 = vpop.eup %847 }
0x1507   :  { %v744_v33 = vsel %vm737_vm8, %v848_v34, 0.0 }
0x1508   :  { %745 = vadd.xlane.f32.xlu1 %v744_v33 }
0x157b   :  { %v746_v6 = vpop.xlane.xlu1 %745 }
0x157c   :  { %849 = vrcp.f32 %v746_v6  ;;  %v758_v40 = vand.u32 2147483648, %v746_v6  ;;  %v756_v1 = vand.u32 2147483647, %v746_v6  ;;  %vm752_vm10 = vweird.f32 %v746_v6 }
0x157e   :  { %v759_v60 = vor.u32 1.1754944e-38, %v758_v40  ;;  %vm757_vm12 = vcmp.eq.f32.partialorder %v756_v1, 8.507059e+37 }
0x1582   :  { %v850_v7 = vpop.eup %849 }
0x1583   :  { %v748_v8 = vmul.f32 %v850_v7, %v746_v6  ;;  %vm753_vm9 = vweird.f32 %v850_v7 }
0x1584   :  { %vm754_vm11 = vmor %vm752_vm10, %vm753_vm9 }
0x1585   :  { %v749_v9 = vsub.f32 1.0, %v748_v8 }
0x1587   :  { %v750_v41 = vmul.f32 %v850_v7, %v749_v9 }
0x1589   :  { %v751_v35 = vadd.f32 %v850_v7, %v750_v41 }
0x158b   :  { %v755_v10 = vsel %vm754_vm11, %v850_v7, %v751_v35 }
0x158c   :  { %v760_v11 = vsel %vm757_vm12, %v759_v60, %v755_v10 }
0x158d   :  { %v761_v12 = vmul.f32 %v848_v34, %v760_v11 }
0x158f   :  { %762 = vst.msk [vmem:[#allocation2] sm:$0xf] %vm737_vm8, %v761_v12 }
0x1590   :  { %773 = dma.vmem_to_hbm [thread:$0]  %s769_s15, 64, %s771_s17, [#allocation3]  }
0x1591   :  { %875 = dma.done.wait [#allocation3], 64  }
0x1592   :  { %876 = vsyncadd [#allocation3], 4294967232 }
0x1593   :  { %778 = vsyncpa [#allocation3], 1 }

</bundles_post_ra>
